<compile_context>
chip_gen: v7x
topology: tpu7x:2x2x1
jax: 0.10.0
libtpu: 0.0.40
codegen_flags: <defaults>
</compile_context>

<pallas_src>
import functools

import jax
import jax.numpy as jnp
import numpy as np
from jax.experimental import pallas as pl
from jax.experimental.pallas import tpu as pltpu


def _round_up(n, m):
    return ((n + m - 1) // m) * m


def mnnet_kernel(x_ref, w1_ref, b1_ref, w2_ref, b2_ref, w3_ref, b3_ref, o_ref):
    """One batch tile, batch on lanes.

    Shapes: x (in_dim, TM); w1 (hidden, in_dim); b1 (hidden, 1);
            w2 (hidden, hidden); b2 (hidden, 1); w3 (out_dim, hidden);
            b3 (out_dim, 1); o (out_dim, TM).
    """
    x = x_ref[...]
    # layer 1: (hidden,in_dim) @ (in_dim,TM) + b1 -> tanh   (MXU + EUP)
    h1 = jnp.tanh(
        jnp.dot(w1_ref[...], x, preferred_element_type=jnp.float32) + b1_ref[...])
    # layer 2: (hidden,hidden) @ (hidden,TM) + b2 -> tanh   (MXU + EUP)
    h2 = jnp.tanh(
        jnp.dot(w2_ref[...], h1, preferred_element_type=jnp.float32) + b2_ref[...])
    # layer 3: (out_dim,hidden) @ (hidden,TM) + b3          (MXU)
    out = jnp.dot(w3_ref[...], h2, preferred_element_type=jnp.float32) + b3_ref[...]
    o_ref[...] = out.astype(o_ref.dtype)


def default_grid_steps():
    # v7x has 2 TensorCores/chip -> one grid step per TC; v5e/v6e have 1 TC.
    try:
        kind = jax.devices()[0].device_kind.lower()
    except Exception:
        return 1
    return 2 if "v7" in kind else 1


@functools.partial(jax.jit, static_argnames=("grid_steps", "max_block_cols"))
def mnnet_forward(x, w1, b1, w2, b2, w3, b3, grid_steps=1, max_block_cols=8192):
    n, in_dim = x.shape
    hidden = w1.shape[1]
    out_dim = w3.shape[1]

    # Lane-axis batch tile: one grid step per TensorCore, always a multiple of 128.
    steps = max(1, int(grid_steps))
    tm = _round_up(pl.cdiv(n, steps), 128)
    tm = min(tm, _round_up(max_block_cols, 128))   # VMEM safety cap for huge N
    n_pad = _round_up(n, tm)

    # One-time wrapper-side relayout: batch on lanes, weights pre-transposed so the
    # kernel needs no in-kernel relayout.
    xt = jnp.pad(x, ((0, n_pad - n), (0, 0))).T          # (in_dim, n_pad)
    w1t, w2t, w3t = w1.T, w2.T, w3.T                     # (h,in), (h,h), (out,h)
    b1c, b2c, b3c = b1.reshape(-1, 1), b2.reshape(-1, 1), b3.reshape(-1, 1)

    grid = (n_pad // tm,)

    def const_spec(a):
        # Full-extent block + constant index_map => stays VMEM-resident across the
        # whole batch grid (no per-step weight/bias re-DMA).
        return pl.BlockSpec(a.shape, lambda i: (0, 0))

    elem = 4  # float32
    flops = 2 * n_pad * (in_dim * hidden + hidden * hidden + hidden * out_dim)
    transcendentals = 2 * n_pad * hidden  # two tanh layers
    bytes_accessed = elem * (
        n_pad * in_dim + n_pad * out_dim
        + w1.size + b1.size + w2.size + b2.size + w3.size + b3.size)

    yt = pl.pallas_call(
        mnnet_kernel,
        grid=grid,
        in_specs=[
            pl.BlockSpec((in_dim, tm), lambda i: (0, i)),   # x tile, batch on lanes
            const_spec(w1t), const_spec(b1c),
            const_spec(w2t), const_spec(b2c),
            const_spec(w3t), const_spec(b3c),
        ],
        out_specs=pl.BlockSpec((out_dim, tm), lambda i: (0, i)),  # lane-dense output
        out_shape=jax.ShapeDtypeStruct((out_dim, n_pad), jnp.float32),
        compiler_params=pltpu.CompilerParams(
            dimension_semantics=("parallel",),  # batch axis -> multi-TC on v7x
        ),
        cost_estimate=pl.CostEstimate(
            flops=flops,
            transcendentals=transcendentals,
            bytes_accessed=bytes_accessed,
        ),
    )(xt, w1t, b1c, w2t, b2c, w3t, b3c)

    return yt.T[:n]


# ----------------------------- init + reference ---------------------------------

def xavier_uniform(key, fan_in, fan_out, gain=1.0):
    # Matches torch.nn.init.xavier_uniform_ (gain=1); stored as (fan_in, fan_out),
    # i.e. already transposed for x @ W.
    limit = gain * np.sqrt(6.0 / (fan_in + fan_out))
    return jax.random.uniform(key, (fan_in, fan_out), jnp.float32, -limit, limit)


def linear_bias(key, fan_in, fan_out):
    # PyTorch nn.Linear default bias init: U(-1/sqrt(fan_in), 1/sqrt(fan_in))
    bound = 1.0 / np.sqrt(fan_in)
    return jax.random.uniform(key, (1, fan_out), jnp.float32, -bound, bound)


def reference_forward(x, w1, b1, w2, b2, w3, b3):
    h1 = jnp.tanh(x @ w1 + b1)
    h2 = jnp.tanh(h1 @ w2 + b2)
    return h2 @ w3 + b3


if __name__ == "__main__":
    # Shapes implied by the module: x = (batch, n_params + 2) (params, vg, vd),
    # hidden = 20, out_dim = 1 (log2(ids) prediction).
    batch, in_dim, hidden, out_dim = 1000, 8, 20, 1

    key = jax.random.PRNGKey(0)
    kx, k1, k2, k3, kb1, kb2, kb3 = jax.random.split(key, 7)

    x = jax.random.normal(kx, (batch, in_dim), jnp.float32)
    w1 = xavier_uniform(k1, in_dim, hidden)
    b1 = linear_bias(kb1, in_dim, hidden)
    w2 = xavier_uniform(k2, hidden, hidden)
    b2 = linear_bias(kb2, hidden, hidden)
    w3 = xavier_uniform(k3, hidden, out_dim)
    b3 = linear_bias(kb3, hidden, out_dim)

    steps = default_grid_steps()  # 1 on v5e/v6e (single TC), 2 on v7x (one per TC)
    y = mnnet_forward(x, w1, b1, w2, b2, w3, b3, grid_steps=steps)
    jax.block_until_ready(y)
    assert y.shape == (batch, out_dim)

    y_ref = reference_forward(x, w1, b1, w2, b2, w3, b3)
    np.testing.assert_allclose(np.asarray(y), np.asarray(y_ref), rtol=1e-5, atol=1e-5)

    print("KERNEL_OK")
</pallas_src>

<mosaic_0001>
module attributes {stable_mosaic.version = 11 : i64} {
  func.func @mnnet_kernel(%arg0: i32, %arg1: memref<8x1024xf32, #tpu.memory_space<vmem>>, %arg2: memref<20x8xf32, #tpu.memory_space<vmem>>, %arg3: memref<20x1xf32, #tpu.memory_space<vmem>>, %arg4: memref<20x20xf32, #tpu.memory_space<vmem>>, %arg5: memref<20x1xf32, #tpu.memory_space<vmem>>, %arg6: memref<1x20xf32, #tpu.memory_space<vmem>>, %arg7: memref<1x1xf32, #tpu.memory_space<vmem>>, %arg8: memref<1x1024xf32, #tpu.memory_space<vmem>>) attributes {dimension_semantics = [#tpu.dimension_semantics<parallel>], iteration_bounds = array<i64: 1>, scalar_prefetch = 0 : i64, scratch_operands = 0 : i64, tpu.core_type = #tpu.core_type<tc>, window_params = [{transform_indices = @transform_0, window_bounds = array<i64: 8, 1024>}, {pipeline_mode = #tpu.pipeline_mode<synchronous>, transform_indices = @transform_1, window_bounds = array<i64: 20, 8>}, {pipeline_mode = #tpu.pipeline_mode<synchronous>, transform_indices = @transform_2, window_bounds = array<i64: 20, 1>}, {pipeline_mode = #tpu.pipeline_mode<synchronous>, transform_indices = @transform_3, window_bounds = array<i64: 20, 20>}, {pipeline_mode = #tpu.pipeline_mode<synchronous>, transform_indices = @transform_4, window_bounds = array<i64: 20, 1>}, {pipeline_mode = #tpu.pipeline_mode<synchronous>, transform_indices = @transform_5, window_bounds = array<i64: 1, 20>}, {pipeline_mode = #tpu.pipeline_mode<synchronous>, transform_indices = @transform_6, window_bounds = array<i64: 1, 1>}, {transform_indices = @transform_7, window_bounds = array<i64: 1, 1024>}]} {
    %c0 = arith.constant 0 : index
    %c0_0 = arith.constant 0 : index
    %0 = vector.load %arg1[%c0, %c0_0] : memref<8x1024xf32, #tpu.memory_space<vmem>>, vector<8x1024xf32>
    %c0_1 = arith.constant 0 : index
    %c0_2 = arith.constant 0 : index
    %1 = vector.load %arg2[%c0_1, %c0_2] : memref<20x8xf32, #tpu.memory_space<vmem>>, vector<20x8xf32>
    %cst = arith.constant dense<0.000000e+00> : vector<20x1024xf32>
    %2 = tpu.matmul %1, %0, %cst {dimension_numbers = #tpu.dot_dimension_numbers<[1], [0], [0], [1], [0, 0, 1, 1], [], []>} : vector<20x8xf32>, vector<8x1024xf32>, vector<20x1024xf32> -> vector<20x1024xf32>
    %c0_3 = arith.constant 0 : index
    %c0_4 = arith.constant 0 : index
    %3 = vector.load %arg3[%c0_3, %c0_4] : memref<20x1xf32, #tpu.memory_space<vmem>>, vector<20x1xf32>
    %4 = vector.broadcast %3 : vector<20x1xf32> to vector<20x1024xf32>
    %5 = arith.addf %2, %4 : vector<20x1024xf32>
    %6 = math.tanh %5 : vector<20x1024xf32>
    %c0_5 = arith.constant 0 : index
    %c0_6 = arith.constant 0 : index
    %7 = vector.load %arg4[%c0_5, %c0_6] : memref<20x20xf32, #tpu.memory_space<vmem>>, vector<20x20xf32>
    %cst_7 = arith.constant dense<0.000000e+00> : vector<20x1024xf32>
    %8 = tpu.matmul %7, %6, %cst_7 {dimension_numbers = #tpu.dot_dimension_numbers<[1], [0], [0], [1], [0, 0, 1, 1], [], []>} : vector<20x20xf32>, vector<20x1024xf32>, vector<20x1024xf32> -> vector<20x1024xf32>
    %c0_8 = arith.constant 0 : index
    %c0_9 = arith.constant 0 : index
    %9 = vector.load %arg5[%c0_8, %c0_9] : memref<20x1xf32, #tpu.memory_space<vmem>>, vector<20x1xf32>
    %10 = vector.broadcast %9 : vector<20x1xf32> to vector<20x1024xf32>
    %11 = arith.addf %8, %10 : vector<20x1024xf32>
    %12 = math.tanh %11 : vector<20x1024xf32>
    %c0_10 = arith.constant 0 : index
    %c0_11 = arith.constant 0 : index
    %13 = vector.load %arg6[%c0_10, %c0_11] : memref<1x20xf32, #tpu.memory_space<vmem>>, vector<1x20xf32>
    %cst_12 = arith.constant dense<0.000000e+00> : vector<1x1024xf32>
    %14 = tpu.matmul %13, %12, %cst_12 {dimension_numbers = #tpu.dot_dimension_numbers<[1], [0], [0], [1], [0, 0, 1, 1], [], []>} : vector<1x20xf32>, vector<20x1024xf32>, vector<1x1024xf32> -> vector<1x1024xf32>
    %c0_13 = arith.constant 0 : index
    %c0_14 = arith.constant 0 : index
    %15 = vector.load %arg7[%c0_13, %c0_14] : memref<1x1xf32, #tpu.memory_space<vmem>>, vector<1x1xf32>
    %16 = vector.broadcast %15 : vector<1x1xf32> to vector<1x1024xf32>
    %17 = arith.addf %14, %16 : vector<1x1024xf32>
    %c0_15 = arith.constant 0 : index
    %c0_16 = arith.constant 0 : index
    %18 = vector.load %arg8[%c0_15, %c0_16] : memref<1x1024xf32, #tpu.memory_space<vmem>>, vector<1x1024xf32>
    tpu.vector_store %arg8[%c0_15, %c0_16], %17 {strides = array<i32>} : memref<1x1024xf32, #tpu.memory_space<vmem>>, vector<1x1024xf32>,
    return
  }
  func.func @transform_0(%arg0: i32) -> (i32, i32) {
    %c0_i32 = arith.constant 0 : i32
    %c0_i32_0 = arith.constant 0 : i32
    return %c0_i32, %arg0 : i32, i32
  }
  func.func @transform_1(%arg0: i32) -> (i32, i32) {
    %c0_i32 = arith.constant 0 : i32
    %c0_i32_0 = arith.constant 0 : i32
    %c0_i32_1 = arith.constant 0 : i32
    return %c0_i32, %c0_i32_0 : i32, i32
  }
  func.func @transform_2(%arg0: i32) -> (i32, i32) {
    %c0_i32 = arith.constant 0 : i32
    %c0_i32_0 = arith.constant 0 : i32
    %c0_i32_1 = arith.constant 0 : i32
    return %c0_i32, %c0_i32_0 : i32, i32
  }
  func.func @transform_3(%arg0: i32) -> (i32, i32) {
    %c0_i32 = arith.constant 0 : i32
    %c0_i32_0 = arith.constant 0 : i32
    %c0_i32_1 = arith.constant 0 : i32
    return %c0_i32, %c0_i32_0 : i32, i32
  }
  func.func @transform_4(%arg0: i32) -> (i32, i32) {
    %c0_i32 = arith.constant 0 : i32
    %c0_i32_0 = arith.constant 0 : i32
    %c0_i32_1 = arith.constant 0 : i32
    return %c0_i32, %c0_i32_0 : i32, i32
  }
  func.func @transform_5(%arg0: i32) -> (i32, i32) {
    %c0_i32 = arith.constant 0 : i32
    %c0_i32_0 = arith.constant 0 : i32
    %c0_i32_1 = arith.constant 0 : i32
    return %c0_i32, %c0_i32_0 : i32, i32
  }
  func.func @transform_6(%arg0: i32) -> (i32, i32) {
    %c0_i32 = arith.constant 0 : i32
    %c0_i32_0 = arith.constant 0 : i32
    %c0_i32_1 = arith.constant 0 : i32
    return %c0_i32, %c0_i32_0 : i32, i32
  }
  func.func @transform_7(%arg0: i32) -> (i32, i32) {
    %c0_i32 = arith.constant 0 : i32
    %c0_i32_0 = arith.constant 0 : i32
    return %c0_i32, %arg0 : i32, i32
  }
}

</mosaic_0001>

<bundles_post_ra>
// kernel: mnnet_forward.1
= control target key start
LH: loop header
LB: loop body
LE: loop exit
PB: predicated region body
PF: predicated region fallthrough
CT: control target
= control target key end

     0   :  { %v1397_v3 = vmov 0.0   ;;  %vm57_vm0 = vcmask 64512   ;;  %v1398_v15 = vmov 0   ;;  %vm454_vm1 = vcmask 1043456   ;;  %s1601_s0 = inlined_call_operand.vmem [shape: f32[8,1024], index: 0, kind: input, shape index: {}]   ;;  %s1602_s1 = inlined_call_operand.vmem [shape: f32[20,8], index: 1, kind: input, shape index: {}]   ;;  %s1603_s6 = inlined_call_operand.<no memory space> [shape: f32[1,1], index: 6, kind: input, shape index: {}]   ;;  %s1604_s2 = inlined_call_operand.vmem [shape: f32[20,1], index: 2, kind: input, shape index: {}]   ;;  %s1605_s4 = inlined_call_operand.vmem [shape: f32[20,1], index: 4, kind: input, shape index: {}]   ;;  %s1606_s3 = inlined_call_operand.vmem [shape: f32[20,20], index: 3, kind: input, shape index: {}]   ;;  %s1607_s5 = inlined_call_operand.vmem [shape: f32[1,20], index: 5, kind: input, shape index: {}]   ;;  %s1608_s7 = inlined_call_operand.vmem [shape: f32[1,1024], index: 7, kind: output, shape index: {}]  }
   0x1   :  { %v29_v0 = vld [vmem:[%s1601_s0 + $0x8] sm:$0xff]  ;;  %v31_v1 = vld [vmem:[%s1601_s0 + $0x18] sm:$0xff]  ;;  %v28_v2 = vld [vmem:[%s1601_s0] sm:$0xff]  ;;  %131 = vmatprep.mubr.f32.mxu0 %v1397_v3  ;;  %214 = vmatprep.mubr.f32.mxu1 %v1397_v3  ;;  %v12_v4 = vstv %s1603_s6  ;;  %vm444_vm2 = vcmask 162816  }
   0x2   :  { %67 = vmatprep.subr.mxu0 %v29_v0  ;;  %150 = vmatprep.subr.mxu1 %v31_v1  ;;  %v30_v5 = vld [vmem:[%s1601_s0 + $0x10] sm:$0xff]  ;;  %v36_v6 = vld [vmem:[%s1602_s1] sm:$0xff]  ;;  %13 = vst [vmem:[#allocation2] sm:$0x1] %v12_v4  ;;  %v33_v7 = vld [vmem:[%s1601_s0 + $0x28] sm:$0xff] }
   0x3   :  { %68 = vmatpush1.msra.mxu0 %v28_v2  ;;  %151 = vmatpush1.msra.mxu1 %v30_v5  ;;  %v35_v8 = vld [vmem:[%s1601_s0 + $0x38] sm:$0xff]  ;;  %v32_v9 = vld [vmem:[%s1601_s0 + $0x20] sm:$0xff]  ;;  %v34_v10 = vld [vmem:[%s1601_s0 + $0x30] sm:$0xff] }
   0x4   :  { %1220 = vmatmul.mubr.msk.f32.vlgmr.msra.gmra.mrb[0].mxu0 %vm57_vm0, %v36_v6  ;;  %1223 = vmatmul.mubr.msk.f32.vlgmr.msra.gmra.mrb[0].mxu1 %vm57_vm0, %v36_v6  ;;  %v37_v11 = vld [vmem:[%s1602_s1 + $0x8] sm:$0xff]  ;;  %v39_v12 = vld [vmem:[%s1604_s2] sm:$0xff]  ;;  %v41_v13 = vld [vmem:[%s1604_s2 + $0x10] sm:$0xf] }
   0x5   :  { %137 = vmatprep.mubr.f32.mxu0 %v1397_v3  ;;  %220 = vmatprep.mubr.f32.mxu1 %v1397_v3  ;;  %v38_v14 = vld [vmem:[%s1602_s1 + $0x10] sm:$0xf]  ;;  %v40_v16 = vld [vmem:[%s1604_s2 + $0x8] sm:$0xff]  ;;  %v426_v17 = vld [vmem:[%s1605_s4] sm:$0xff] }
   0x6   :  { %233 = vmatprep.subr.mxu0 %v33_v7  ;;  %316 = vmatprep.subr.mxu1 %v35_v8  ;;  %v427_v18 = vld [vmem:[%s1605_s4 + $0x8] sm:$0xff]  ;;  %v428_v19 = vld [vmem:[%s1605_s4 + $0x10] sm:$0xf] }
   0x7   :  { %234 = vmatpush1.msra.mxu0 %v32_v9  ;;  %317 = vmatpush1.msra.mxu1 %v34_v10 }
   0x8   :  { %1221 = vmatmul.mubr.msk.f32.gmra.mrb[2].mxu0 %vm57_vm0, %v37_v11  ;;  %1224 = vmatmul.mubr.msk.f32.gmra.mrb[2].mxu1 %vm57_vm0, %v37_v11 }
   0x9   :  { %143 = vmatprep.mubr.f32.mxu0 %v1397_v3  ;;  %226 = vmatprep.mubr.f32.mxu1 %v1397_v3  ;;  %v836_v20 = vld [vmem:[#allocation2] sm:$0x1] }
   0xa   :  { %1299 = vset.pattern.permute.xlu0 %v1398_v15  ;;  %1300 = vset.pattern.permute.xlu1 %v1398_v15 }
   0xb   :  { %44 = vperm.xlu0 %1299, %v39_v12   ;;  %54 = vperm.xlu1 %1300, %v41_v13  }
   0xc   :  { %1222 = vmatmul.mubr.msk.f32.gmra.mrb[4].mxu0 %vm57_vm0, %v38_v14  ;;  %1225 = vmatmul.mubr.msk.f32.gmra.mrb[4].mxu1 %vm57_vm0, %v38_v14 }
   0xd   :  { %297 = vmatprep.mubr.f32.mxu0 %v1397_v3  ;;  %380 = vmatprep.mubr.f32.mxu1 %v1397_v3 }
   0xf   :  { %49 = vperm.xlu0 %1299, %v40_v16   ;;  %431 = vperm.xlu1 %1300, %v426_v17  }
  0x10   :  { %1226 = vmatmul.mubr.msk.f32.vlgmr.msra.gmra.mrb[6].mxu0 %vm57_vm0, %v36_v6  ;;  %1229 = vmatmul.mubr.msk.f32.vlgmr.msra.gmra.mrb[6].mxu1 %vm57_vm0, %v36_v6 }
  0x11   :  { %303 = vmatprep.mubr.f32.mxu0 %v1397_v3  ;;  %386 = vmatprep.mubr.f32.mxu1 %v1397_v3 }
  0x13   :  { %436 = vperm.xlu0 %1299, %v427_v18   ;;  %441 = vperm.xlu1 %1300, %v428_v19  }
  0x14   :  { %1227 = vmatmul.mubr.msk.f32.gmra.mrb[8].mxu0 %vm57_vm0, %v37_v11  ;;  %1230 = vmatmul.mubr.msk.f32.gmra.mrb[8].mxu1 %vm57_vm0, %v37_v11 }
  0x15   :  { %309 = vmatprep.mubr.f32.mxu0 %v1397_v3  ;;  %392 = vmatprep.mubr.f32.mxu1 %v1397_v3 }
  0x17   :  { %839 = vperm.xlu0 %1299, %v836_v20  }
  0x18   :  { %1228 = vmatmul.mubr.msk.f32.gmra.mrb[10].mxu0 %vm57_vm0, %v38_v14  ;;  %1231 = vmatmul.mubr.msk.f32.gmra.mrb[10].mxu1 %vm57_vm0, %v38_v14 }
  0x19   :  { %543 = vmatprep.mubr.f32.mxu0 %v1397_v3  ;;  %626 = vmatprep.mubr.f32.mxu1 %v1397_v3 }
  0x8a   :  { %v45_v21 = vpop.permute.xlu0 %44  ;;  %v1520_v39 = vpop.permute.xlu1 %54 }
  0x8e   :  { %v50_v30 = vpop.permute.xlu0 %49 }
  0xd7   :  { %v133_v22 = vpop.f32.mrb[0].mxu0  ;;  %v216_v23 = vpop.f32.mrb[0].mxu1 }
  0xd8   :  { %v134_v24 = vadd.f32 %v133_v22, %v45_v21  ;;  %v217_v25 = vadd.f32 %v216_v23, %v45_v21  ;;  %v135_v26 = vpop.f32.mrb[1].mxu0  ;;  %v218_v27 = vpop.f32.mrb[1].mxu1 }
  0xd9   :  { %v136_v28 = vadd.f32 %v135_v26, %v45_v21  ;;  %v219_v29 = vadd.f32 %v218_v27, %v45_v21  ;;  %v423_v26 = vld [vmem:[%s1606_s3] sm:$0xff] }
  0xda   :  { %1301 = vtanh.f32 %v134_v24 }
  0xdb   :  { %1303 = vtanh.f32 %v217_v25  ;;  %v139_v31 = vpop.f32.mrb[2].mxu0  ;;  %v222_v32 = vpop.f32.mrb[2].mxu1 }
  0xdc   :  { %1305 = vtanh.f32 %v136_v28  ;;  %v140_v33 = vadd.f32 %v139_v31, %v50_v30  ;;  %v223_v34 = vadd.f32 %v222_v32, %v50_v30  ;;  %v141_v35 = vpop.f32.mrb[3].mxu0  ;;  %v224_v36 = vpop.f32.mrb[3].mxu1  ;;  %v424_v31 = vld [vmem:[%s1606_s3 + $0x8] sm:$0xff] }
  0xdd   :  { %1307 = vtanh.f32 %v219_v29  ;;  %v142_v37 = vadd.f32 %v141_v35, %v50_v30  ;;  %v225_v38 = vadd.f32 %v224_v36, %v50_v30 }
  0xde   :  { %1309 = vtanh.f32 %v140_v33 }
  0xdf   :  { %1311 = vtanh.f32 %v223_v34  ;;  %v145_v40 = vpop.f32.mrb[4].mxu0  ;;  %v228_v41 = vpop.f32.mrb[4].mxu1 }
  0xe0   :  { %1313 = vtanh.f32 %v142_v37  ;;  %v146_v42 = vadd.f32 %v145_v40, %v1520_v39  ;;  %v229_v43 = vadd.f32 %v228_v41, %v1520_v39  ;;  %v147_v44 = vpop.f32.mrb[5].mxu0  ;;  %v230_v45 = vpop.f32.mrb[5].mxu1 }
  0xe1   :  { %1315 = vtanh.f32 %v225_v38  ;;  %v148_v46 = vadd.f32 %v147_v44, %v1520_v39  ;;  %v231_v47 = vadd.f32 %v230_v45, %v1520_v39  ;;  %v432_v44 = vpop.permute.xlu1 %431 }
  0xe2   :  { %1317 = vtanh.f32 %v146_v42 }
  0xe3   :  { %1319 = vtanh.f32 %v229_v43  ;;  %v299_v48 = vpop.f32.mrb[6].mxu0  ;;  %v382_v49 = vpop.f32.mrb[6].mxu1 }
  0xe4   :  { %v1302_v50 = vpop.eup %1301  ;;  %1321 = vtanh.f32 %v148_v46  ;;  %v300_v51 = vadd.f32 %v299_v48, %v45_v21  ;;  %v383_v52 = vadd.f32 %v382_v49, %v45_v21  ;;  %v301_v53 = vpop.f32.mrb[7].mxu0 }
  0xe5   :  { %v384_v54 = vpop.f32.mrb[7].mxu1  ;;  %v1304_v55 = vpop.eup %1303  ;;  %1323 = vtanh.f32 %v231_v47  ;;  %v302_v56 = vadd.f32 %v301_v53, %v45_v21 }
  0xe6   :  { %v385_v57 = vadd.f32 %v384_v54, %v45_v21  ;;  %v1306_v58 = vpop.eup %1305  ;;  %1325 = vtanh.f32 %v300_v51  ;;  %v437_v53 = vpop.permute.xlu0 %436 }
  0xe7   :  { %v1308_v59 = vpop.eup %1307  ;;  %1327 = vtanh.f32 %v383_v52  ;;  %v305_v60 = vpop.f32.mrb[8].mxu0 }
  0xe8   :  { %v388_v61 = vpop.f32.mrb[8].mxu1  ;;  %v1310_v62 = vpop.eup %1309  ;;  %1329 = vtanh.f32 %v302_v56  ;;  %v306_v63 = vadd.f32 %v305_v60, %v50_v30 }
  0xe9   :  { %v389_v0 = vadd.f32 %v388_v61, %v50_v30  ;;  %v307_v1 = vpop.f32.mrb[9].mxu0  ;;  %v390_v2 = vpop.f32.mrb[9].mxu1  ;;  %1331 = vtanh.f32 %v385_v57  ;;  %v1266_v7 = vpack.c.bf16 %v1310_v62, %v1302_v50 }
  0xea   :  { %v1312_v4 = vpop.eup %1311  ;;  %v308_v5 = vadd.f32 %v307_v1, %v50_v30  ;;  %v391_v6 = vadd.f32 %v390_v2, %v50_v30  ;;  %1333 = vtanh.f32 %v306_v63  ;;  %v1571_v62 = vpop.permute.xlu1 %441 }
  0xeb   :  { %v1314_v8 = vpop.eup %1313  ;;  %v1270_v9 = vpack.c.bf16 %v1312_v4, %v1304_v55  ;;  %1335 = vtanh.f32 %v389_v0  ;;  %v311_v11 = vpop.f32.mrb[10].mxu0 }
  0xec   :  { %v1316_v10 = vpop.eup %1315  ;;  %v394_v12 = vpop.f32.mrb[10].mxu1  ;;  %v1264_v13 = vpack.c.bf16 %v1314_v8, %v1306_v58  ;;  %1337 = vtanh.f32 %v308_v5  ;;  %v312_v23 = vadd.f32 %v311_v11, %v1520_v39 }
  0xed   :  { %v1318_v14 = vpop.eup %1317  ;;  %v313_v15 = vpop.f32.mrb[11].mxu0  ;;  %v1268_v17 = vpack.c.bf16 %v1316_v10, %v1308_v59  ;;  %1339 = vtanh.f32 %v391_v6  ;;  %v395_v25 = vadd.f32 %v394_v12, %v1520_v39 }
  0xee   :  { %v396_v16 = vpop.f32.mrb[11].mxu1  ;;  %v1320_v18 = vpop.eup %1319  ;;  %v314_v19 = vadd.f32 %v313_v15, %v1520_v39  ;;  %1265 = vmatprep.subr.bf16.mxu0 %v1264_v13 }
  0xef   :  { %v397_v20 = vadd.f32 %v396_v16, %v1520_v39  ;;  %v1322_v21 = vpop.eup %1321  ;;  %1269 = vmatprep.subr.bf16.mxu1 %v1268_v17  ;;  %1267 = vmatpush1.bf16.msra.mxu0 %v1266_v7  ;;  %v425_v39 = vld [vmem:[%s1606_s3 + $0x10] sm:$0xf] }
  0xf0   :  { %v1324_v22 = vpop.eup %1323  ;;  %1271 = vmatpush1.bf16.msra.mxu1 %v1270_v9  ;;  %1232 = vmatprep.subr.msk.mxu0 %vm454_vm1, %v1322_v21  ;;  %1341 = vtanh.f32 %v314_v19 }
  0xf1   :  { %v1326_v24 = vpop.eup %1325  ;;  %1237 = vmatprep.subr.msk.mxu1 %vm454_vm1, %v1324_v22  ;;  %1343 = vtanh.f32 %v397_v20 }
  0xf2   :  { %v1328_v27 = vpop.eup %1327  ;;  %1345 = vtanh.f32 %v312_v23 }
  0xf3   :  { %v1330_v28 = vpop.eup %1329  ;;  %1233 = vmatpush1.msk.msra.mxu0 %vm454_vm1, %v1318_v14  ;;  %1347 = vtanh.f32 %v395_v25 }
  0xf4   :  { %v1332_v29 = vpop.eup %1331  ;;  %1238 = vmatpush1.msk.msra.mxu1 %vm454_vm1, %v1320_v18  ;;  %1234 = vmatmul.mubr.msk.f32.vlgmr.msra.gmra.mrb[12].mxu0 %vm444_vm2, %v423_v26 }
  0xf5   :  { %v1334_v30 = vpop.eup %1333  ;;  %1239 = vmatmul.mubr.msk.f32.vlgmr.msra.gmra.mrb[12].mxu1 %vm444_vm2, %v423_v26  ;;  %549 = vmatprep.mubr.f32.mxu0 %v1397_v3 }
  0xf6   :  { %v1336_v32 = vpop.eup %1335  ;;  %632 = vmatprep.mubr.f32.mxu1 %v1397_v3  ;;  %v1274_v33 = vpack.c.bf16 %v1334_v30, %v1326_v24 }
  0xf7   :  { %v1338_v34 = vpop.eup %1337  ;;  %v1278_v35 = vpack.c.bf16 %v1336_v32, %v1328_v27 }
  0xf8   :  { %v1340_v36 = vpop.eup %1339  ;;  %1235 = vmatmul.mubr.msk.f32.gmra.mrb[14].mxu0 %vm444_vm2, %v424_v31  ;;  %v1272_v37 = vpack.c.bf16 %v1338_v34, %v1330_v28 }
  0xf9   :  { %1240 = vmatmul.mubr.msk.f32.gmra.mrb[14].mxu1 %vm444_vm2, %v424_v31  ;;  %v1276_v38 = vpack.c.bf16 %v1340_v36, %v1332_v29  ;;  %555 = vmatprep.mubr.f32.mxu0 %v1397_v3 }
  0xfa   :  { %1273 = vmatprep.subr.bf16.mxu0 %v1272_v37  ;;  %638 = vmatprep.mubr.f32.mxu1 %v1397_v3  ;;  %v1342_v40 = vpop.eup %1341 }
  0xfb   :  { %1277 = vmatprep.subr.bf16.mxu1 %v1276_v38  ;;  %1275 = vmatpush1.bf16.msra.mxu0 %v1274_v33  ;;  %v1344_v41 = vpop.eup %1343 }
  0xfc   :  { %1279 = vmatpush1.bf16.msra.mxu1 %v1278_v35  ;;  %1236 = vmatmul.mubr.msk.f32.gmra.mrb[16].mxu0 %vm444_vm2, %v425_v39  ;;  %v1346_v42 = vpop.eup %1345 }
  0xfd   :  { %1241 = vmatmul.mubr.msk.f32.gmra.mrb[16].mxu1 %vm444_vm2, %v425_v39  ;;  %1242 = vmatprep.subr.msk.mxu0 %vm454_vm1, %v1342_v40  ;;  %v1348_v43 = vpop.eup %1347 }
  0xfe   :  { %1247 = vmatprep.subr.msk.mxu1 %vm454_vm1, %v1344_v41  ;;  %709 = vmatprep.mubr.f32.mxu0 %v1397_v3 }
  0xff   :  { %1243 = vmatpush1.msk.msra.mxu0 %vm454_vm1, %v1346_v42  ;;  %792 = vmatprep.mubr.f32.mxu1 %v1397_v3 }
 0x100   :  { %1248 = vmatpush1.msk.msra.mxu1 %vm454_vm1, %v1348_v43  ;;  %1244 = vmatmul.mubr.msk.f32.vlgmr.msra.gmra.mrb[18].mxu0 %vm444_vm2, %v423_v26 }
 0x101   :  { %1249 = vmatmul.mubr.msk.f32.vlgmr.msra.gmra.mrb[18].mxu1 %vm444_vm2, %v423_v26  ;;  %715 = vmatprep.mubr.f32.mxu0 %v1397_v3 }
 0x102   :  { %798 = vmatprep.mubr.f32.mxu1 %v1397_v3 }
 0x104   :  { %1245 = vmatmul.mubr.msk.f32.gmra.mrb[20].mxu0 %vm444_vm2, %v424_v31 }
 0x105   :  { %1250 = vmatmul.mubr.msk.f32.gmra.mrb[20].mxu1 %vm444_vm2, %v424_v31  ;;  %721 = vmatprep.mubr.f32.mxu0 %v1397_v3 }
 0x106   :  { %804 = vmatprep.mubr.f32.mxu1 %v1397_v3 }
 0x108   :  { %1246 = vmatmul.mubr.msk.f32.gmra.mrb[22].mxu0 %vm444_vm2, %v425_v39 }
 0x109   :  { %1251 = vmatmul.mubr.msk.f32.gmra.mrb[22].mxu1 %vm444_vm2, %v425_v39  ;;  %937 = vmatprep.mubr.f32.mxu0 %v1397_v3 }
 0x10a   :  { %1008 = vmatprep.mubr.f32.mxu1 %v1397_v3 }
 0x1c7   :  { %v545_v45 = vpop.f32.mrb[12].mxu0 }
 0x1c8   :  { %v546_v46 = vadd.f32 %v545_v45, %v432_v44  ;;  %v628_v47 = vpop.f32.mrb[12].mxu1  ;;  %v547_v48 = vpop.f32.mrb[13].mxu0 }
 0x1c9   :  { %v629_v49 = vadd.f32 %v628_v47, %v432_v44  ;;  %v548_v50 = vadd.f32 %v547_v48, %v432_v44  ;;  %v630_v51 = vpop.f32.mrb[13].mxu1 }
 0x1ca   :  { %1349 = vtanh.f32 %v546_v46  ;;  %v631_v52 = vadd.f32 %v630_v51, %v432_v44 }
 0x1cb   :  { %1351 = vtanh.f32 %v629_v49  ;;  %v551_v54 = vpop.f32.mrb[14].mxu0  ;;  %v835_v49 = vld [vmem:[%s1607_s5] sm:$0x1] }
 0x1cc   :  { %1353 = vtanh.f32 %v548_v50  ;;  %v552_v55 = vadd.f32 %v551_v54, %v437_v53  ;;  %v634_v56 = vpop.f32.mrb[14].mxu1  ;;  %v553_v57 = vpop.f32.mrb[15].mxu0 }
 0x1cd   :  { %1355 = vtanh.f32 %v631_v52  ;;  %v635_v58 = vadd.f32 %v634_v56, %v437_v53  ;;  %v554_v59 = vadd.f32 %v553_v57, %v437_v53  ;;  %v636_v60 = vpop.f32.mrb[15].mxu1 }
 0x1ce   :  { %1357 = vtanh.f32 %v552_v55  ;;  %v637_v61 = vadd.f32 %v636_v60, %v437_v53 }
 0x1cf   :  { %1359 = vtanh.f32 %v635_v58  ;;  %v557_v63 = vpop.f32.mrb[16].mxu0 }
 0x1d0   :  { %1361 = vtanh.f32 %v554_v59  ;;  %v558_v0 = vadd.f32 %v557_v63, %v1571_v62  ;;  %v640_v1 = vpop.f32.mrb[16].mxu1  ;;  %v559_v2 = vpop.f32.mrb[17].mxu0 }
 0x1d1   :  { %1363 = vtanh.f32 %v637_v61  ;;  %v641_v4 = vadd.f32 %v640_v1, %v1571_v62  ;;  %v560_v5 = vadd.f32 %v559_v2, %v1571_v62  ;;  %v642_v6 = vpop.f32.mrb[17].mxu1  ;;  %v1399_v2 = vmov 1966171168  }
 0x1d2   :  { %1365 = vtanh.f32 %v558_v0  ;;  %v643_v7 = vadd.f32 %v642_v6, %v1571_v62  ;;  %v840_v6 = vpop.permute.xlu0 %839 }
 0x1d3   :  { %1367 = vtanh.f32 %v641_v4  ;;  %v711_v8 = vpop.f32.mrb[18].mxu0  ;;  %v1170_v4 = vunpack.c.l.s4 %v1399_v2 }
 0x1d4   :  { %v1350_v9 = vpop.eup %1349  ;;  %1369 = vtanh.f32 %v560_v5  ;;  %v712_v10 = vadd.f32 %v711_v8, %v432_v44  ;;  %v794_v11 = vpop.f32.mrb[18].mxu1 }
 0x1d5   :  { %v713_v12 = vpop.f32.mrb[19].mxu0  ;;  %v1352_v13 = vpop.eup %1351  ;;  %1371 = vtanh.f32 %v643_v7  ;;  %v795_v14 = vadd.f32 %v794_v11, %v432_v44  ;;  %v1171_v7 = vunpack.c.0.s8 %v1170_v4 }
 0x1d6   :  { %v714_v15 = vadd.f32 %v713_v12, %v432_v44  ;;  %v796_v16 = vpop.f32.mrb[19].mxu1  ;;  %v1354_v17 = vpop.eup %1353  ;;  %1373 = vtanh.f32 %v712_v10 }
 0x1d7   :  { %v797_v18 = vadd.f32 %v796_v16, %v432_v44  ;;  %v1356_v19 = vpop.eup %1355  ;;  %1375 = vtanh.f32 %v795_v14  ;;  %v717_v20 = vpop.f32.mrb[20].mxu0 }
 0x1d8   :  { %v1358_v21 = vpop.eup %1357  ;;  %1377 = vtanh.f32 %v714_v15  ;;  %v718_v22 = vadd.f32 %v717_v20, %v437_v53  ;;  %v800_v23 = vpop.f32.mrb[20].mxu1 }
 0x1d9   :  { %v719_v24 = vpop.f32.mrb[21].mxu0  ;;  %v1360_v25 = vpop.eup %1359  ;;  %1379 = vtanh.f32 %v797_v18  ;;  %v801_v26 = vadd.f32 %v800_v23, %v437_v53  ;;  %v1282_v29 = vpack.c.bf16 %v1358_v21, %v1350_v9 }
 0x1da   :  { %v720_v27 = vadd.f32 %v719_v24, %v437_v53  ;;  %v802_v28 = vpop.f32.mrb[21].mxu1  ;;  %v1362_v30 = vpop.eup %1361  ;;  %1381 = vtanh.f32 %v718_v22  ;;  %v1286_v32 = vpack.c.bf16 %v1360_v25, %v1352_v13 }
 0x1db   :  { %v803_v31 = vadd.f32 %v802_v28, %v437_v53  ;;  %v1364_v33 = vpop.eup %1363  ;;  %1383 = vtanh.f32 %v801_v26  ;;  %v723_v34 = vpop.f32.mrb[22].mxu0  ;;  %v1280_v35 = vpack.c.bf16 %v1362_v30, %v1354_v17 }
 0x1dc   :  { %v1366_v36 = vpop.eup %1365  ;;  %1385 = vtanh.f32 %v720_v27  ;;  %v806_v37 = vpop.f32.mrb[22].mxu1  ;;  %v1284_v39 = vpack.c.bf16 %v1364_v33, %v1356_v19  ;;  %v724_v46 = vadd.f32 %v723_v34, %v1571_v62 }
 0x1dd   :  { %v725_v38 = vpop.f32.mrb[23].mxu0  ;;  %v1368_v40 = vpop.eup %1367  ;;  %1387 = vtanh.f32 %v803_v31  ;;  %1281 = vmatprep.subr.bf16.mxu0 %v1280_v35  ;;  %v807_v48 = vadd.f32 %v806_v37, %v1571_v62 }
 0x1de   :  { %v726_v41 = vadd.f32 %v725_v38, %v1571_v62  ;;  %v808_v42 = vpop.f32.mrb[23].mxu1  ;;  %v1370_v43 = vpop.eup %1369  ;;  %1285 = vmatprep.subr.bf16.mxu1 %v1284_v39  ;;  %1283 = vmatpush1.bf16.msra.mxu0 %v1282_v29 }
 0x1df   :  { %v809_v44 = vadd.f32 %v808_v42, %v1571_v62  ;;  %v1372_v45 = vpop.eup %1371  ;;  %1287 = vmatpush1.bf16.msra.mxu1 %v1286_v32  ;;  %1252 = vmatprep.subr.msk.mxu0 %vm454_vm1, %v1370_v43 }
 0x1e0   :  { %v1374_v47 = vpop.eup %1373  ;;  %1389 = vtanh.f32 %v726_v41  ;;  %1255 = vmatprep.subr.msk.mxu1 %vm454_vm1, %v1372_v45 }
 0x1e1   :  { %v1376_v50 = vpop.eup %1375  ;;  %1391 = vtanh.f32 %v809_v44 }
 0x1e2   :  { %v1378_v51 = vpop.eup %1377  ;;  %1253 = vmatpush1.msk.msra.mxu0 %vm454_vm1, %v1366_v36  ;;  %1393 = vtanh.f32 %v724_v46 }
 0x1e3   :  { %v1380_v52 = vpop.eup %1379  ;;  %1256 = vmatpush1.msk.msra.mxu1 %vm454_vm1, %v1368_v40  ;;  %1254 = vmatmul.mubr.msk.f32.vlgmr.msra.gmra.mrb[24].mxu0 %vm444_vm2, %v835_v49  ;;  %1395 = vtanh.f32 %v807_v48 }
 0x1e4   :  { %v1382_v53 = vpop.eup %1381  ;;  %1257 = vmatmul.mubr.msk.f32.vlgmr.msra.gmra.mrb[24].mxu1 %vm444_vm2, %v835_v49  ;;  %1079 = vmatprep.mubr.f32.mxu0 %v1397_v3 }
 0x1e5   :  { %v1384_v54 = vpop.eup %1383  ;;  %v1290_v55 = vpack.c.bf16 %v1382_v53, %v1374_v47  ;;  %1150 = vmatprep.mubr.f32.mxu1 %v1397_v3  ;;  %v842_v3 = vlaneseq }
 0x1e6   :  { %v1386_v56 = vpop.eup %1385  ;;  %v1294_v57 = vpack.c.bf16 %v1384_v54, %v1376_v50 }
 0x1e7   :  { %v1388_v58 = vpop.eup %1387  ;;  %v1288_v59 = vpack.c.bf16 %v1386_v56, %v1378_v51  ;;  %v843_v1 = vshrl.u32 %v842_v3, 7 }
 0x1e8   :  { %v1292_v60 = vpack.c.bf16 %v1388_v58, %v1380_v52 }
 0x1e9   :  { %1289 = vmatprep.subr.bf16.mxu0 %v1288_v59  ;;  %v844_v5 = vsub.s32 0, %v843_v1  ;;  %v1174_v13 = vsub.s32 %v1171_v7, %v843_v1 }
 0x1ea   :  { %v1390_v61 = vpop.eup %1389  ;;  %1293 = vmatprep.subr.bf16.mxu1 %v1292_v60  ;;  %1291 = vmatpush1.bf16.msra.mxu0 %v1290_v55 }
 0x1eb   :  { %v1392_v62 = vpop.eup %1391  ;;  %1295 = vmatpush1.bf16.msra.mxu1 %v1294_v57  ;;  %1258 = vmatprep.subr.msk.mxu0 %vm454_vm1, %v1390_v61  ;;  %v845_v8 = vrot.slane %v840_v6, %v844_v5 }
 0x1ec   :  { %1261 = vmatprep.subr.msk.mxu1 %vm454_vm1, %v1392_v62  ;;  %v1394_v63 = vpop.eup %1393 }
 0x1ed   :  { %v1396_v0 = vpop.eup %1395 }
 0x1ee   :  { %1259 = vmatpush1.msk.msra.mxu0 %vm454_vm1, %v1394_v63 }
 0x1ef   :  { %1262 = vmatpush1.msk.msra.mxu1 %vm454_vm1, %v1396_v0  ;;  %1260 = vmatmul.mubr.msk.f32.vlgmr.msra.gmra.mrb[26].mxu0 %vm444_vm2, %v835_v49 }
 0x1f0   :  { %1263 = vmatmul.mubr.msk.f32.vlgmr.msra.gmra.mrb[26].mxu1 %vm444_vm2, %v835_v49 }
 0x2b6   :  { %v939_v9 = vpop.f32.mrb[24].mxu0 }
 0x2b7   :  { %v940_v10 = vadd.f32 %v939_v9, %v845_v8  ;;  %v1010_v11 = vpop.f32.mrb[24].mxu1  ;;  %v941_v12 = vpop.f32.mrb[25].mxu0 }
 0x2b8   :  { %v1011_v14 = vadd.f32 %v1010_v11, %v845_v8  ;;  %v942_v15 = vadd.f32 %v941_v12, %v845_v8  ;;  %v1012_v16 = vpop.f32.mrb[25].mxu1 }
 0x2b9   :  { %v1013_v17 = vadd.f32 %v1012_v16, %v845_v8 }
 0x2ba   :  { %v1165_v18 = vcombine.low %v940_v10, %v942_v15 }
 0x2bb   :  { %v1166_v19 = vcombine.low %v1011_v14, %v1013_v17 }
 0x2bc   :  { %v1175_v20 = vrot.slane %v1165_v18, %v1174_v13 }
 0x2bd   :  { %v1182_v21 = vrot.slane %v1166_v19, %v1174_v13 }
 0x2bf   :  { %v1197_v22 = vcombine.low %v1175_v20, %v1182_v21 }
 0x2c1   :  { %v1205_v36 = vrot.slane %v1197_v22, %v1174_v13 }
 0x2c2   :  { %v1081_v23 = vpop.f32.mrb[26].mxu0 }
 0x2c3   :  { %v1082_v24 = vadd.f32 %v1081_v23, %v845_v8  ;;  %v1152_v25 = vpop.f32.mrb[26].mxu1  ;;  %v1083_v26 = vpop.f32.mrb[27].mxu0 }
 0x2c4   :  { %v1153_v27 = vadd.f32 %v1152_v25, %v845_v8  ;;  %v1084_v28 = vadd.f32 %v1083_v26, %v845_v8  ;;  %v1154_v29 = vpop.f32.mrb[27].mxu1 }
 0x2c5   :  { %v1155_v30 = vadd.f32 %v1154_v29, %v845_v8 }
 0x2c6   :  { %v1167_v31 = vcombine.low %v1082_v24, %v1084_v28 }
 0x2c7   :  { %v1168_v32 = vcombine.low %v1153_v27, %v1155_v30 }
 0x2c8   :  { %v1189_v33 = vrot.slane %v1167_v31, %v1174_v13 }
 0x2c9   :  { %v1196_v34 = vrot.slane %v1168_v32, %v1174_v13 }
 0x2cb   :  { %v1198_v35 = vcombine.low %v1189_v33, %v1196_v34 }
 0x2cd   :  { %v1212_v37 = vrot.slane %v1198_v35, %v1174_v13 }
 0x2cf   :  { %v1213_v38 = vcombine.low %v1205_v36, %v1212_v37 }
 0x2d1   :  { %1215 = vst [vmem:[%s1608_s7] sm:$0xff] %v1213_v38 }

</bundles_post_ra>
